<compile_context>
chip_gen: v7x
topology: tpu7x:2x2x1
jax: 0.10.0
libtpu: 0.0.40
codegen_flags: <defaults>
</compile_context>

<pallas_src>
import jax
import jax.numpy as jnp
from jax.experimental import pallas as pl
from jax.experimental.pallas import tpu as pltpu


def _round_up(x, m):
    return (x + m - 1) // m * m


def _reviser_kernel(sh_ref, th_ref, se_ref, te_ref,
                    w1_ref, b1_ref, w2_ref, b2_ref,
                    hid_ref, inc_ref):
    """One (TILE_N, D) row tile of the Reviser MLP.

    sh/th/se/te : (TILE_N, D) f32 activation tiles.
    w1 (4D, F) bf16, b1 (1, F) f32, w2 (F, D) bf16, b2 (1, D) f32 — resident.
    hid/inc     : (TILE_N, D) f32 output tiles.
    """
    D = sh_ref.shape[1]

    sh = sh_ref[...]                       # f32, reused for the residual add

    # First linear: concat([sh, th, se, te]) @ w1, computed as four split-K
    # matmuls against static row chunks of w1 (no (N, 4D) concat in HBM).
    # bf16 MXU operands, f32 accumulation.
    h = jnp.dot(sh.astype(jnp.bfloat16), w1_ref[0:D, :],
                preferred_element_type=jnp.float32)
    h += jnp.dot(th_ref[...].astype(jnp.bfloat16), w1_ref[D:2 * D, :],
                 preferred_element_type=jnp.float32)
    h += jnp.dot(se_ref[...].astype(jnp.bfloat16), w1_ref[2 * D:3 * D, :],
                 preferred_element_type=jnp.float32)
    h += jnp.dot(te_ref[...].astype(jnp.bfloat16), w1_ref[3 * D:4 * D, :],
                 preferred_element_type=jnp.float32)
    h += b1_ref[...]
    h = jnp.maximum(h, 0.0)                # ReLU
    # TODO(synk): nn.Dropout is identity at inference; training-mode dropout
    # (pltpu.prng_random_bits masking) is not implemented here.

    inc = jnp.dot(h.astype(jnp.bfloat16), w2_ref[...],
                  preferred_element_type=jnp.float32) + b2_ref[...]

    inc_ref[...] = inc.astype(inc_ref.dtype)
    hid_ref[...] = (sh + inc).astype(hid_ref.dtype)


def reviser_forward(source_hidden, target_hidden, token, params, *,
                    tile_n_max=512):
    """source_hidden/target_hidden: (B, S, D) f32, token: (B, S) int32."""
    B, S, D = source_hidden.shape
    N = B * S
    F_ = params["w1"].shape[1]

    # Frozen-embedding gathers (pure XLA gather; no clean in-kernel equivalent
    # for an arbitrary row gather without manual DMA, so it stays in the glue).
    tok = token.reshape(N)
    src_emb = jnp.take(params["source_embed"], tok, axis=0)   # (N, D) f32
    tgt_emb = jnp.take(params["target_embed"], tok, axis=0)   # (N, D) f32

    sh = source_hidden.reshape(N, D)
    th = target_hidden.reshape(N, D)

    # Row tiling: pad N up to a multiple of the tile so every grid step sees a
    # full, 8-aligned block (no ragged last tile).
    tile_n = min(tile_n_max, _round_up(N, 8))
    n_pad = _round_up(N, tile_n)
    if n_pad != N:
        pad = ((0, n_pad - N), (0, 0))
        sh = jnp.pad(sh, pad)
        th = jnp.pad(th, pad)
        src_emb = jnp.pad(src_emb, pad)
        tgt_emb = jnp.pad(tgt_emb, pad)

    # bf16 weights (halves weight DMA + resident VMEM); f32 biases.
    w1 = params["w1"].astype(jnp.bfloat16)                    # (4D, F)
    w2 = params["w2"].astype(jnp.bfloat16)                    # (F, D)
    b1 = params["b1"].reshape(1, F_).astype(jnp.float32)
    b2 = params["b2"].reshape(1, D).astype(jnp.float32)

    grid = (n_pad // tile_n,)

    # VMEM budget: double-buffered f32 activation tiles + resident bf16 weights.
    act_bytes = (4 + 2) * 2 * tile_n * D * 4
    wgt_bytes = 2 * (2 * (4 * D * F_ + F_ * D) + 4 * (F_ + D))
    vmem_limit = int(min(64 << 20, max(32 << 20, 2 * (act_bytes + wgt_bytes))))

    row_spec = pl.BlockSpec((tile_n, D), lambda i: (i, 0))
    hid, inc = pl.pallas_call(
        _reviser_kernel,
        grid=grid,
        in_specs=[
            row_spec,                                     # source_hidden rows
            row_spec,                                     # target_hidden rows
            row_spec,                                     # source token embed
            row_spec,                                     # target token embed
            pl.BlockSpec((4 * D, F_), lambda i: (0, 0)),  # w1 (resident)
            pl.BlockSpec((1, F_), lambda i: (0, 0)),      # b1 (resident)
            pl.BlockSpec((F_, D), lambda i: (0, 0)),      # w2 (resident)
            pl.BlockSpec((1, D), lambda i: (0, 0)),       # b2 (resident)
        ],
        out_specs=(row_spec, row_spec),
        out_shape=(
            jax.ShapeDtypeStruct((n_pad, D), source_hidden.dtype),  # hidden
            jax.ShapeDtypeStruct((n_pad, D), source_hidden.dtype),  # increase
        ),
        # `hidden` reuses the source_hidden row buffer (same shape/dtype).
        input_output_aliases={0: 0},
        compiler_params=pltpu.CompilerParams(
            dimension_semantics=("parallel",),
            vmem_limit_bytes=vmem_limit,
        ),
    )(sh, th, src_emb, tgt_emb, w1, b1, w2, b2)

    # TODO(synk): for D < 128 (toy config) the (tile_n, D) output stores are
    # lane-masked; production D >= 128 keeps them lane-dense.

    return hid[:N].reshape(B, S, D), inc[:N].reshape(B, S, D)


def init_params(key, vocab_size, dimension, ffn_size):
    k = jax.random.split(key, 6)
    scale1 = 1.0 / jnp.sqrt(4 * dimension)
    scale2 = 1.0 / jnp.sqrt(ffn_size)
    return {
        # Frozen pretrained embedding tables (random stand-ins, f32).
        "source_embed": jax.random.normal(k[0], (vocab_size, dimension), jnp.float32),
        "target_embed": jax.random.normal(k[1], (vocab_size, dimension), jnp.float32),
        # Linear(4D -> F), stored (in, out); bf16 weights, f32 accumulate in-kernel.
        "w1": jax.random.uniform(k[2], (4 * dimension, ffn_size), jnp.float32,
                                 -scale1, scale1).astype(jnp.bfloat16),
        "b1": jax.random.uniform(k[3], (ffn_size,), jnp.float32, -scale1, scale1),
        # Linear(F -> D)
        "w2": jax.random.uniform(k[4], (ffn_size, dimension), jnp.float32,
                                 -scale2, scale2).astype(jnp.bfloat16),
        "b2": jax.random.uniform(k[5], (dimension,), jnp.float32, -scale2, scale2),
    }


if __name__ == "__main__":
    B, S, D, FFN, VOCAB = 2, 8, 32, 128, 64   # 4*D = 128 (lane-aligned K)

    key = jax.random.PRNGKey(0)
    kp, ks, kt, kk = jax.random.split(key, 4)

    params = init_params(kp, VOCAB, D, FFN)
    source_hidden = jax.random.normal(ks, (B, S, D), jnp.float32)
    target_hidden = jax.random.normal(kt, (B, S, D), jnp.float32)
    token = jax.random.randint(kk, (B, S), 0, VOCAB, dtype=jnp.int32)

    fwd = jax.jit(reviser_forward)
    hidden, increase = fwd(source_hidden, target_hidden, token, params)
    jax.block_until_ready((hidden, increase))

    # --- Reference 1: same bf16-operand / f32-accumulate math as the kernel.
    src_e = jnp.take(params["source_embed"], token.reshape(-1), axis=0).reshape(B, S, D)
    tgt_e = jnp.take(params["target_embed"], token.reshape(-1), axis=0).reshape(B, S, D)
    xb = jnp.concatenate([source_hidden, target_hidden, src_e, tgt_e],
                         axis=-1).astype(jnp.bfloat16)
    h_ref = jnp.maximum(
        jnp.dot(xb.reshape(-1, 4 * D), params["w1"],
                preferred_element_type=jnp.float32) + params["b1"], 0.0)
    inc_ref = (jnp.dot(h_ref.astype(jnp.bfloat16), params["w2"],
                       preferred_element_type=jnp.float32)
               + params["b2"]).reshape(B, S, D)
    hid_ref = source_hidden + inc_ref
    assert jnp.allclose(increase, inc_ref, atol=1e-3, rtol=1e-3)
    assert jnp.allclose(hidden, hid_ref, atol=1e-3, rtol=1e-3)

    # --- Reference 2: full-f32 module semantics (loose tol for bf16 matmuls).
    xf = jnp.concatenate([source_hidden, target_hidden, src_e, tgt_e], axis=-1)
    h32 = jnp.maximum(
        xf.reshape(-1, 4 * D) @ params["w1"].astype(jnp.float32) + params["b1"], 0.0)
    inc32 = (h32 @ params["w2"].astype(jnp.float32) + params["b2"]).reshape(B, S, D)
    assert jnp.allclose(increase, inc32, atol=5e-2, rtol=5e-2)
    assert jnp.allclose(hidden, source_hidden + inc32, atol=5e-2, rtol=5e-2)

    print("KERNEL_OK")
</pallas_src>

<mosaic_0001>
module attributes {stable_mosaic.version = 11 : i64} {
  func.func @_reviser_kernel(%arg0: i32, %arg1: memref<16x32xf32, #tpu.memory_space<vmem>>, %arg2: memref<16x32xf32, #tpu.memory_space<vmem>>, %arg3: memref<16x32xf32, #tpu.memory_space<vmem>>, %arg4: memref<16x32xf32, #tpu.memory_space<vmem>>, %arg5: memref<128x128xbf16, #tpu.memory_space<vmem>>, %arg6: memref<1x128xf32, #tpu.memory_space<vmem>>, %arg7: memref<128x32xbf16, #tpu.memory_space<vmem>>, %arg8: memref<1x32xf32, #tpu.memory_space<vmem>>, %arg9: memref<16x32xf32, #tpu.memory_space<vmem>>, %arg10: memref<16x32xf32, #tpu.memory_space<vmem>>) attributes {dimension_semantics = [#tpu.dimension_semantics<parallel>], iteration_bounds = array<i64: 1>, scalar_prefetch = 0 : i64, scratch_operands = 0 : i64, tpu.core_type = #tpu.core_type<tc>, window_params = [{transform_indices = @transform_0, window_bounds = array<i64: 16, 32>}, {transform_indices = @transform_1, window_bounds = array<i64: 16, 32>}, {transform_indices = @transform_2, window_bounds = array<i64: 16, 32>}, {transform_indices = @transform_3, window_bounds = array<i64: 16, 32>}, {pipeline_mode = #tpu.pipeline_mode<synchronous>, transform_indices = @transform_4, window_bounds = array<i64: 128, 128>}, {pipeline_mode = #tpu.pipeline_mode<synchronous>, transform_indices = @transform_5, window_bounds = array<i64: 1, 128>}, {pipeline_mode = #tpu.pipeline_mode<synchronous>, transform_indices = @transform_6, window_bounds = array<i64: 128, 32>}, {pipeline_mode = #tpu.pipeline_mode<synchronous>, transform_indices = @transform_7, window_bounds = array<i64: 1, 32>}, {transform_indices = @transform_8, window_bounds = array<i64: 16, 32>}, {transform_indices = @transform_9, window_bounds = array<i64: 16, 32>}]} {
    %c0 = arith.constant 0 : index
    %c0_0 = arith.constant 0 : index
    %0 = vector.load %arg1[%c0, %c0_0] : memref<16x32xf32, #tpu.memory_space<vmem>>, vector<16x32xf32>
    %1 = arith.truncf %0 : vector<16x32xf32> to vector<16x32xbf16>
    %c0_1 = arith.constant 0 : index
    %c0_2 = arith.constant 0 : index
    %2 = vector.load %arg5[%c0_1, %c0_2] : memref<128x128xbf16, #tpu.memory_space<vmem>>, vector<32x128xbf16>
    %cst = arith.constant dense<0.000000e+00> : vector<16x128xf32>
    %3 = tpu.matmul %1, %2, %cst {dimension_numbers = #tpu.dot_dimension_numbers<[1], [0], [0], [1], [0, 0, 1, 1], [], []>} : vector<16x32xbf16>, vector<32x128xbf16>, vector<16x128xf32> -> vector<16x128xf32>
    %c0_3 = arith.constant 0 : index
    %c0_4 = arith.constant 0 : index
    %4 = vector.load %arg2[%c0_3, %c0_4] : memref<16x32xf32, #tpu.memory_space<vmem>>, vector<16x32xf32>
    %5 = arith.truncf %4 : vector<16x32xf32> to vector<16x32xbf16>
    %c32 = arith.constant 32 : index
    %c0_5 = arith.constant 0 : index
    %6 = vector.load %arg5[%c32, %c0_5] : memref<128x128xbf16, #tpu.memory_space<vmem>>, vector<32x128xbf16>
    %cst_6 = arith.constant dense<0.000000e+00> : vector<16x128xf32>
    %7 = tpu.matmul %5, %6, %cst_6 {dimension_numbers = #tpu.dot_dimension_numbers<[1], [0], [0], [1], [0, 0, 1, 1], [], []>} : vector<16x32xbf16>, vector<32x128xbf16>, vector<16x128xf32> -> vector<16x128xf32>
    %8 = arith.addf %3, %7 : vector<16x128xf32>
    %c0_7 = arith.constant 0 : index
    %c0_8 = arith.constant 0 : index
    %9 = vector.load %arg3[%c0_7, %c0_8] : memref<16x32xf32, #tpu.memory_space<vmem>>, vector<16x32xf32>
    %10 = arith.truncf %9 : vector<16x32xf32> to vector<16x32xbf16>
    %c64 = arith.constant 64 : index
    %c0_9 = arith.constant 0 : index
    %11 = vector.load %arg5[%c64, %c0_9] : memref<128x128xbf16, #tpu.memory_space<vmem>>, vector<32x128xbf16>
    %cst_10 = arith.constant dense<0.000000e+00> : vector<16x128xf32>
    %12 = tpu.matmul %10, %11, %cst_10 {dimension_numbers = #tpu.dot_dimension_numbers<[1], [0], [0], [1], [0, 0, 1, 1], [], []>} : vector<16x32xbf16>, vector<32x128xbf16>, vector<16x128xf32> -> vector<16x128xf32>
    %13 = arith.addf %8, %12 : vector<16x128xf32>
    %c0_11 = arith.constant 0 : index
    %c0_12 = arith.constant 0 : index
    %14 = vector.load %arg4[%c0_11, %c0_12] : memref<16x32xf32, #tpu.memory_space<vmem>>, vector<16x32xf32>
    %15 = arith.truncf %14 : vector<16x32xf32> to vector<16x32xbf16>
    %c96 = arith.constant 96 : index
    %c0_13 = arith.constant 0 : index
    %16 = vector.load %arg5[%c96, %c0_13] : memref<128x128xbf16, #tpu.memory_space<vmem>>, vector<32x128xbf16>
    %cst_14 = arith.constant dense<0.000000e+00> : vector<16x128xf32>
    %17 = tpu.matmul %15, %16, %cst_14 {dimension_numbers = #tpu.dot_dimension_numbers<[1], [0], [0], [1], [0, 0, 1, 1], [], []>} : vector<16x32xbf16>, vector<32x128xbf16>, vector<16x128xf32> -> vector<16x128xf32>
    %18 = arith.addf %13, %17 : vector<16x128xf32>
    %c0_15 = arith.constant 0 : index
    %c0_16 = arith.constant 0 : index
    %19 = vector.load %arg6[%c0_15, %c0_16] : memref<1x128xf32, #tpu.memory_space<vmem>>, vector<1x128xf32>
    %20 = vector.broadcast %19 : vector<1x128xf32> to vector<16x128xf32>
    %21 = arith.addf %18, %20 : vector<16x128xf32>
    %cst_17 = arith.constant 0.000000e+00 : f32
    %22 = vector.broadcast %cst_17 : f32 to vector<16x128xf32>
    %23 = arith.maximumf %21, %22 : vector<16x128xf32>
    %24 = arith.truncf %23 : vector<16x128xf32> to vector<16x128xbf16>
    %c0_18 = arith.constant 0 : index
    %c0_19 = arith.constant 0 : index
    %25 = vector.load %arg7[%c0_18, %c0_19] : memref<128x32xbf16, #tpu.memory_space<vmem>>, vector<128x32xbf16>
    %cst_20 = arith.constant dense<0.000000e+00> : vector<16x32xf32>
    %26 = tpu.matmul %24, %25, %cst_20 {dimension_numbers = #tpu.dot_dimension_numbers<[1], [0], [0], [1], [0, 0, 1, 1], [], []>} : vector<16x128xbf16>, vector<128x32xbf16>, vector<16x32xf32> -> vector<16x32xf32>
    %c0_21 = arith.constant 0 : index
    %c0_22 = arith.constant 0 : index
    %27 = vector.load %arg8[%c0_21, %c0_22] : memref<1x32xf32, #tpu.memory_space<vmem>>, vector<1x32xf32>
    %28 = vector.broadcast %27 : vector<1x32xf32> to vector<16x32xf32>
    %29 = arith.addf %26, %28 : vector<16x32xf32>
    %c0_23 = arith.constant 0 : index
    %c0_24 = arith.constant 0 : index
    %30 = vector.load %arg10[%c0_23, %c0_24] : memref<16x32xf32, #tpu.memory_space<vmem>>, vector<16x32xf32>
    tpu.vector_store %arg10[%c0_23, %c0_24], %29 {strides = array<i32>} : memref<16x32xf32, #tpu.memory_space<vmem>>, vector<16x32xf32>,
    %31 = arith.addf %0, %29 : vector<16x32xf32>
    %c0_25 = arith.constant 0 : index
    %c0_26 = arith.constant 0 : index
    %32 = vector.load %arg9[%c0_25, %c0_26] : memref<16x32xf32, #tpu.memory_space<vmem>>, vector<16x32xf32>
    tpu.vector_store %arg9[%c0_25, %c0_26], %31 {strides = array<i32>} : memref<16x32xf32, #tpu.memory_space<vmem>>, vector<16x32xf32>,
    return
  }
  func.func @transform_0(%arg0: i32) -> (i32, i32) {
    %c0_i32 = arith.constant 0 : i32
    %c0_i32_0 = arith.constant 0 : i32
    return %arg0, %c0_i32 : i32, i32
  }
  func.func @transform_1(%arg0: i32) -> (i32, i32) {
    %c0_i32 = arith.constant 0 : i32
    %c0_i32_0 = arith.constant 0 : i32
    return %arg0, %c0_i32 : i32, i32
  }
  func.func @transform_2(%arg0: i32) -> (i32, i32) {
    %c0_i32 = arith.constant 0 : i32
    %c0_i32_0 = arith.constant 0 : i32
    return %arg0, %c0_i32 : i32, i32
  }
  func.func @transform_3(%arg0: i32) -> (i32, i32) {
    %c0_i32 = arith.constant 0 : i32
    %c0_i32_0 = arith.constant 0 : i32
    return %arg0, %c0_i32 : i32, i32
  }
  func.func @transform_4(%arg0: i32) -> (i32, i32) {
    %c0_i32 = arith.constant 0 : i32
    %c0_i32_0 = arith.constant 0 : i32
    %c0_i32_1 = arith.constant 0 : i32
    return %c0_i32, %c0_i32_0 : i32, i32
  }
  func.func @transform_5(%arg0: i32) -> (i32, i32) {
    %c0_i32 = arith.constant 0 : i32
    %c0_i32_0 = arith.constant 0 : i32
    %c0_i32_1 = arith.constant 0 : i32
    return %c0_i32, %c0_i32_0 : i32, i32
  }
  func.func @transform_6(%arg0: i32) -> (i32, i32) {
    %c0_i32 = arith.constant 0 : i32
    %c0_i32_0 = arith.constant 0 : i32
    %c0_i32_1 = arith.constant 0 : i32
    return %c0_i32, %c0_i32_0 : i32, i32
  }
  func.func @transform_7(%arg0: i32) -> (i32, i32) {
    %c0_i32 = arith.constant 0 : i32
    %c0_i32_0 = arith.constant 0 : i32
    %c0_i32_1 = arith.constant 0 : i32
    return %c0_i32, %c0_i32_0 : i32, i32
  }
  func.func @transform_8(%arg0: i32) -> (i32, i32) {
    %c0_i32 = arith.constant 0 : i32
    %c0_i32_0 = arith.constant 0 : i32
    return %arg0, %c0_i32 : i32, i32
  }
  func.func @transform_9(%arg0: i32) -> (i32, i32) {
    %c0_i32 = arith.constant 0 : i32
    %c0_i32_0 = arith.constant 0 : i32
    return %arg0, %c0_i32 : i32, i32
  }
}

</mosaic_0001>

<bundles_post_ra>
// kernel: reviser_forward.1
= control target key start
LH: loop header
LB: loop body
LE: loop exit
PB: predicated region body
PF: predicated region fallthrough
CT: control target
= control target key end

     0   :  { %v580_v1 = vmov 0.0   ;;  %vm581_vm0 = vmmov 0   ;;  %vm59_vm1 = vcmask 261120   ;;  %s773_s0 = inlined_call_operand.vmem [shape: f32[16,32], index: 0, kind: input, shape index: {}, may-alias: {0,8}]   ;;  %s774_s1 = inlined_call_operand.vmem [shape: f32[16,32], index: 1, kind: input, shape index: {}]   ;;  %s775_s2 = inlined_call_operand.vmem [shape: f32[16,32], index: 2, kind: input, shape index: {}]   ;;  %s776_s3 = inlined_call_operand.vmem [shape: f32[16,32], index: 3, kind: input, shape index: {}]   ;;  %s777_s4 = inlined_call_operand.vmem [shape: bf16[128,128], index: 4, kind: input, shape index: {}]   ;;  %s778_s5 = inlined_call_operand.vmem [shape: f32[1,128], index: 5, kind: input, shape index: {}]   ;;  %s779_s6 = inlined_call_operand.vmem [shape: bf16[128,32], index: 6, kind: input, shape index: {}]   ;;  %s780_s7 = inlined_call_operand.vmem [shape: f32[1,32], index: 7, kind: input, shape index: {}]   ;;  %s781_s8 = inlined_call_operand.vmem [shape: f32[16,32], index: 8, kind: output, shape index: {0}, may-alias: {0,8}]   ;;  %s782_s9 = inlined_call_operand.hbm [shape: f32[16,32], index: 9, kind: output, shape index: {1}]  }
   0x1   :  { %v540_v0 = vld [vmem:[%s777_s4 + $0x10] sm:$0xff]   ;;  %483 = vmatprep.subr.bf16.mxu1 %v580_v1  ;;  %v541_v2 = vld [vmem:[%s777_s4 + $0x18] sm:$0xff]   ;;  %515 = vmatprep.subr.bf16.mxu0 %v580_v1  ;;  %v40_v3 = vld [vmem:[%s774_s1] sm:$0xff] }
   0x2   :  { %484 = vmatpush3.bf16.msra.mxu1 %v540_v0  ;;  %487 = vmatprep.mubr.msk.bf16.mxu1 %vm581_vm0, %v580_v1  ;;  %v41_v4 = vld [vmem:[%s774_s1 + $0x8] sm:$0xff]  ;;  %v542_v6 = vld [vmem:[%s777_s4] sm:$0xff]  }
   0x3   :  { %485 = vmatprep.subr.bf16.mxu1 %v580_v1  ;;  %531 = vmatprep.mubr.msk.bf16.mxu0 %vm581_vm0, %v580_v1  ;;  %v42_v5 = vpack.c.bf16 %v41_v4, %v40_v3  ;;  %v543_v7 = vld [vmem:[%s777_s4 + $0x8] sm:$0xff]   ;;  %v667_v8 = vld [vmem:[%s773_s0] sm:$0xff] }
   0x4   :  { %v672_v9 = vld [vmem:[%s773_s0 + $0x8] sm:$0xff]  ;;  %v544_v10 = vld [vmem:[%s777_s4 + $0x20] sm:$0xff]  }
   0x5   :  { %v35_v11 = vpack.c.bf16 %v672_v9, %v667_v8 }
   0x6   :  { %486 = vmatpush3.bf16.msra.mxu1 %v541_v2 }
   0x7   :  { %491 = vmatprep.subr.bf16.mxu1 %v580_v1 }
   0x9   :  { %488 = vmatmul.mubr.msk.bf16.vlgmr.msra.gmra.mrb[0].mxu1 %vm59_vm1, %v42_v5 }
   0xa   :  { %492 = vmatpush3.bf16.msra.mxu1 %v542_v6  ;;  %495 = vmatprep.mubr.msk.bf16.mxu1 %vm581_vm0, %v580_v1 }
   0xb   :  { %493 = vmatprep.subr.bf16.mxu1 %v580_v1 }
   0xe   :  { %494 = vmatpush3.bf16.msra.mxu1 %v543_v7 }
   0xf   :  { %499 = vmatprep.subr.bf16.mxu1 %v580_v1 }
  0x10   :  { %15 = vsyncpa [#allocation3], 0  ;;  %v545_v12 = vld [vmem:[%s777_s4 + $0x28] sm:$0xff]   ;;  %v160_v13 = vld [vmem:[%s775_s2] sm:$0xff]  ;;  %s582_s11 = smov [#allocation2]  }
  0x11   :  { %496 = vmatmul.mubr.msk.bf16.vlgmr.msra.gmra.mrb[4].mxu1 %vm59_vm1, %v35_v11  ;;  %v161_v14 = vld [vmem:[%s775_s2 + $0x8] sm:$0xff]  ;;  %v546_v16 = vld [vmem:[%s777_s4 + $0x30] sm:$0xff]   ;;  %v547_v17 = vld [vmem:[%s777_s4 + $0x38] sm:$0xff]   ;;  %s427_s12 = sshll.u32 %s582_s11, 4  ;;  %s428_s12 = int_to_ptr.vmem [resolvable:$true] %s427_s12 }
  0x12   :  { %500 = vmatpush3.bf16.msra.mxu1 %v544_v10  ;;  %503 = vmatprep.mubr.msk.bf16.mxu1 %vm581_vm0, %v580_v1  ;;  %v162_v15 = vpack.c.bf16 %v161_v14, %v160_v13  ;;  %v225_v18 = vld [vmem:[%s776_s3] sm:$0xff]  ;;  %v226_v19 = vld [vmem:[%s776_s3 + $0x8] sm:$0xff]  ;;  %v550_v23 = vld [vmem:[%s779_s6 + $0x10] sm:$0xff]   ;;  %p561_p1 = scmp.lt.s32.totalorder %s428_s12, %s428_s12 }
  0x13   :  { %501 = vmatprep.subr.bf16.mxu1 %v580_v1  ;;  %v227_v20 = vpack.c.bf16 %v226_v19, %v225_v18  ;;  %v548_v21 = vld [vmem:[%s779_s6] sm:$0xff]   ;;  %v549_v22 = vld [vmem:[%s779_s6 + $0x8] sm:$0xff]   ;;  %v551_v24 = vld [vmem:[%s779_s6 + $0x18] sm:$0xff]  }
  0x14   :  { %516 = vmatpush3.bf16.msra.mxu0 %v548_v21  ;;  %v552_v25 = vld [vmem:[%s779_s6 + $0x20] sm:$0xff]   ;;  %v553_v26 = vld [vmem:[%s779_s6 + $0x28] sm:$0xff]   ;;  %v554_v27 = vld [vmem:[%s779_s6 + $0x30] sm:$0xff]  }
  0x15   :  { %517 = vmatprep.subr.bf16.mxu0 %v580_v1  ;;  %v555_v28 = vld [vmem:[%s779_s6 + $0x38] sm:$0xff]   ;;  %v452_v46 = vld [vmem:[%s778_s5] ss:$0 sm:$0xff] }
  0x16   :  { %502 = vmatpush3.bf16.msra.mxu1 %v545_v12  ;;  %v453_v57 = vld [vmem:[%s780_s7] ss:$0 sm:$0xff]  ;;  %s556_s7 = scalar_lea.vmem %s428_s12, 256 }
  0x17   :  { %507 = vmatprep.subr.bf16.mxu1 %v580_v1  ;;  %p557_p0 = scmp.ne.s32.totalorder %s428_s12, %s556_s7  ;;  %p562_p2 = scmp.lt.s32.totalorder %s556_s7, %s556_s7 }
  0x18   :  { %518 = vmatpush3.bf16.msra.mxu0 %v549_v22 }
  0x19   :  { %504 = vmatmul.mubr.msk.bf16.vlgmr.msra.gmra.mrb[8].mxu1 %vm59_vm1, %v162_v15  ;;  %519 = vmatprep.subr.bf16.mxu0 %v580_v1  ;;  %p563_p3 = por %p562_p2, %p561_p1 }
  0x1a   :  { %508 = vmatpush3.bf16.msra.mxu1 %v546_v16  ;;  %511 = vmatprep.mubr.msk.bf16.mxu1 %vm581_vm0, %v580_v1 }
  0x1b   :  { %509 = vmatprep.subr.bf16.mxu1 %v580_v1  ;;  %p564_p4 = pnand %p563_p3, %p557_p0 }
  0x1c   :  { %520 = vmatpush3.bf16.msra.mxu0 %v550_v23 }
  0x1d   :  { %521 = vmatprep.subr.bf16.mxu0 %v580_v1 }
  0x1e   :  { %510 = vmatpush3.bf16.msra.mxu1 %v547_v17 }
  0x20   :  { %522 = vmatpush3.bf16.msra.mxu0 %v551_v24 }
  0x21   :  { %512 = vmatmul.mubr.msk.bf16.vlgmr.msra.gmra.mrb[12].mxu1 %vm59_vm1, %v227_v20  ;;  %523 = vmatprep.subr.bf16.mxu0 %v580_v1 }
  0x24   :  { %524 = vmatpush3.bf16.msra.mxu0 %v552_v25 }
  0x25   :  { %525 = vmatprep.subr.bf16.mxu0 %v580_v1 }
  0x28   :  { %526 = vmatpush3.bf16.msra.mxu0 %v553_v26 }
  0x29   :  { %527 = vmatprep.subr.bf16.mxu0 %v580_v1 }
  0x2c   :  { %528 = vmatpush3.bf16.msra.mxu0 %v554_v27 }
  0x2d   :  { %529 = vmatprep.subr.bf16.mxu0 %v580_v1 }
  0x30   :  { %530 = vmatpush3.bf16.msra.mxu0 %v555_v28 }
  0xdc   :  { %v97_v29 = vpop.f32.mrb[0].mxu1 }
  0xdd   :  { %v489_v30 = vpop.f32.mrb[1].mxu1 }
  0xde   :  { %v100_v31 = vpop.f32.mrb[2].mxu1 }
  0xdf   :  { %v490_v32 = vpop.f32.mrb[3].mxu1 }
  0xe4   :  { %v153_v33 = vpop.f32.mrb[4].mxu1 }
  0xe5   :  { %v154_v34 = vadd.f32 %v153_v33, %v97_v29  ;;  %v497_v35 = vpop.f32.mrb[5].mxu1 }
  0xe6   :  { %v156_v36 = vpop.f32.mrb[6].mxu1 }
  0xe7   :  { %v157_v37 = vadd.f32 %v156_v36, %v100_v31  ;;  %v498_v38 = vpop.f32.mrb[7].mxu1 }
  0xec   :  { %v216_v39 = vpop.f32.mrb[8].mxu1 }
  0xed   :  { %v223_v40 = vadd.f32 %v216_v39, %v154_v34  ;;  %v505_v41 = vpop.f32.mrb[9].mxu1 }
  0xee   :  { %v219_v42 = vpop.f32.mrb[10].mxu1 }
  0xef   :  { %v224_v43 = vadd.f32 %v219_v42, %v157_v37  ;;  %v506_v44 = vpop.f32.mrb[11].mxu1 }
  0xf4   :  { %v281_v45 = vpop.f32.mrb[12].mxu1 }
  0xf5   :  { %v288_v47 = vadd.f32 %v281_v45, %v223_v40  ;;  %v513_v48 = vpop.f32.mrb[13].mxu1 }
  0xf6   :  { %v284_v49 = vpop.f32.mrb[14].mxu1 }
  0xf7   :  { %v297_v50 = vadd.f32 %v452_v46, %v288_v47  ;;  %v289_v51 = vadd.f32 %v284_v49, %v224_v43  ;;  %v514_v52 = vpop.f32.mrb[15].mxu1 }
  0xf9   :  { %v298_v53 = vadd.f32 %v452_v46, %v289_v51  ;;  %v299_v54 = vmax.f32 %v297_v50, 0.0 }
  0xfb   :  { %v300_v55 = vmax.f32 %v298_v53, 0.0 }
  0xfd   :  { %v301_v56 = vpack.c.bf16 %v300_v55, %v299_v54 }
  0xff   :  { %532 = vmatmul.mubr.bf16.vlgmr.msra.gmra.mrb[0].mxu0 %v301_v56 }
 0x1d2   :  { %v407_v58 = vpop.f32.mrb[0].mxu0 }
 0x1d3   :  { %v408_v59 = vadd.f32 %v453_v57, %v407_v58  ;;  %v533_v60 = vpop.f32.mrb[1].mxu0 }
 0x1d4   :  { %v410_v61 = vpop.f32.mrb[2].mxu0 }
 0x1d5   :  { %414 = vst.msk [vmem:[#allocation2] sm:$0xff] %vm59_vm1, %v408_v59  ;;  %v416_v62 = vadd.f32 %v408_v59, %v667_v8  ;;  %v411_v63 = vadd.f32 %v453_v57, %v410_v61  ;;  %v534_v0 = vpop.f32.mrb[3].mxu0 }
 0x1d7   :  { %418 = vst.msk [vmem:[%s781_s8] sm:$0xff] %vm59_vm1, %v416_v62  ;;  %415 = vst.msk [vmem:[#allocation2 + $0x8] sm:$0xff] %vm59_vm1, %v411_v63  ;;  %v417_v1 = vadd.f32 %v411_v63, %v672_v9 }
 0x1d8   :  { %567 = shalt.err (!%p564_p4)
}
 0x1d9   :  { %s568_s15 = scalar_lea.hbm %s782_s9, 256 }
 0x1da   :  { %p569_p5 = scmp.ne.s32.totalorder %s782_s9, %s568_s15  ;;  %p572_p6 = scmp.lt.u32.totalorder %s568_s15, %s782_s9 }
 0x1dc   :  { %p574_p7 = pnand %p572_p6, %p569_p5 }
 0x1de   :  { %577 = shalt.err (!%p574_p7)
}
 0x1df   :  { %s583_s19 = smov 128   ;;  %s584_s3 = smov 8   ;;  %419 = vst.msk [vmem:[%s781_s8 + $0x8] sm:$0xff] %vm59_vm1, %v417_v1 }
 0x1e0   :  { %433 = dma.vmem_to_hbm [thread:$0]  %s428_s12, 256, %s782_s9, [#allocation3], %s583_s19, %s583_s19, %s584_s3  }
 0x1e1   :  { %578 = dma.done.wait [#allocation3], 256  }
 0x1e2   :  { %579 = vsyncadd [#allocation3], 4294967040 }
 0x1e3   :  { %439 = vsyncpa [#allocation3], 1 }

</bundles_post_ra>
